<compile_context>
chip_gen: v7x
topology: tpu7x:2x2x1
jax: 0.10.0
libtpu: 0.0.40
codegen_flags: <defaults>
</compile_context>

<pallas_src>
import math

import jax
import jax.numpy as jnp
from jax.experimental import pallas as pl
from jax.experimental.pallas import tpu as pltpu


def _round_up(n, m):
    return ((n + m - 1) // m) * m


def _largest_divisor_leq(n, cap):
    cap = max(1, min(n, cap))
    d = cap
    while n % d:
        d -= 1
    return d


# Row offsets of each sub-table inside the stacked temporal table.
_HOUR_OFF = 0          # 24 rows
_WDAY_OFF = 24         # 7 rows
_DAY_OFF = 31          # 32 rows
_MON_OFF = 63          # 13 rows
_TEMPORAL_ROWS = 76        # 24 + 7 + 32 + 13
_TEMPORAL_ROWS_PAD = 128   # lane-aligned K for the multi-hot matmul


# ---------------------------------------------------------------------------
# Pallas kernel
# ---------------------------------------------------------------------------
def data_embedding_kernel(vlen_ref, xw_ref, idx_ref, w_ref, ttbl_ref, pos_ref,
                          o_ref):
    # vlen_ref : (B,)          int32  SMEM (scalar prefetch)  valid visit lens
    # xw_ref   : (NB, TL, 3C)  bf16   windowed values [x[l-1] | x[l] | x[l+1]]
    # idx_ref  : (NB, TL, 1)   int32  packed temporal offsets (4 x 8-bit)
    # w_ref    : (3C, D)       bf16   fused conv taps (VMEM-resident)
    # ttbl_ref : (2, 128, D)   bf16   hi/lo split stacked temporal table
    # pos_ref  : (TL, D)       bf16   positional rows for this l-tile
    # o_ref    : (NB, TL, D)   out_dtype
    li = pl.program_id(0)
    bg = pl.program_id(1)
    nb, tl, _ = o_ref.shape
    n_rows = ttbl_ref.shape[1]                                   # 128

    # Hoisted, reused across the (small, static) NB loop.
    w = w_ref[...]                                               # (3C, D)
    t_hi = ttbl_ref[0]                                           # (128, D)
    t_lo = ttbl_ref[1]                                           # (128, D)
    pos = pos_ref[...].astype(jnp.float32)                       # (TL, D)
    l_ids = li * tl + jax.lax.broadcasted_iota(jnp.int32, (tl, 1), 0)
    iota = jax.lax.broadcasted_iota(jnp.int32, (tl, n_rows), 1)  # (TL, 128)

    for n in range(nb):   # static unroll; NB is small
        # (1) value embedding: circular conv1d(k=3) as ONE fused bf16 MXU matmul.
        acc = jnp.dot(xw_ref[n], w, preferred_element_type=jnp.float32)

        # (2) temporal embedding: multi-hot (boolean OR, single bf16 cast)
        #     against the hi/lo-split table -> two bf16 MXU matmuls, f32 acc.
        packed = idx_ref[n]                                      # (TL, 1) int32
        hot = ((iota == (packed & 0x7F))
               | (iota == ((packed >> 8) & 0x7F))
               | (iota == ((packed >> 16) & 0x7F))
               | (iota == ((packed >> 24) & 0x7F))).astype(jnp.bfloat16)
        acc += jnp.dot(hot, t_hi, preferred_element_type=jnp.float32)
        acc += jnp.dot(hot, t_lo, preferred_element_type=jnp.float32)

        # (3) positional embedding: row l gets pos_tbl[l+1] iff l < visit_len[b].
        vl = vlen_ref[bg * nb + n]
        acc += jnp.where(l_ids < vl, pos, 0.0)

        o_ref[n] = acc.astype(o_ref.dtype)


# ---------------------------------------------------------------------------
# Parameter / table construction (deterministic, matches PyTorch __init__)
# ---------------------------------------------------------------------------
def make_fixed_embedding_table(c_in, d_model):
    """FixedEmbedding weight (c_in, d_model), sinusoidal, non-trainable."""
    position = jnp.arange(c_in, dtype=jnp.float32)[:, None]
    div_term = jnp.exp(
        jnp.arange(0, d_model, 2, dtype=jnp.float32)
        * -(math.log(10000.0) / d_model)
    )
    w = jnp.zeros((c_in, d_model), dtype=jnp.float32)
    w = w.at[:, 0::2].set(jnp.sin(position * div_term))
    w = w.at[:, 1::2].set(jnp.cos(position * div_term))
    return w


def make_positional_encoding_table(d_model, max_len=500):
    """PositionalEmbedding table ((max_len+1, d_model)); row 0 is the zero pad."""
    j = jnp.arange(d_model)
    pos = jnp.arange(max_len, dtype=jnp.float32)[:, None]
    angle = pos / jnp.power(10000.0, 2.0 * (j // 2).astype(jnp.float32) / d_model)
    pe = jnp.where((j % 2) == 0, jnp.sin(angle), jnp.cos(angle))
    pe = jnp.concatenate([jnp.zeros((1, d_model), dtype=jnp.float32),
                          pe.astype(jnp.float32)], axis=0)
    return pe


def make_token_conv_weight(key, c_in, d_model):
    """Conv1d weight (d_model, c_in, 3), kaiming_normal fan_in / leaky_relu."""
    gain = math.sqrt(2.0)          # PyTorch default a=0 for leaky_relu gain
    fan_in = c_in * 3
    std = gain / math.sqrt(fan_in)
    return std * jax.random.normal(key, (d_model, c_in, 3), dtype=jnp.float32)


# ---------------------------------------------------------------------------
# Wrapper
# ---------------------------------------------------------------------------
def data_embedding_forward(x, visit_len, x_mark, params, *,
                           tile_len=2048, max_rows_per_step=4096,
                           out_dtype=jnp.bfloat16):
    """
    x        : (B, L, c_in)    float32
    visit_len: (B,)            int32   (valid visit lengths, <= L)
    x_mark   : (B, L, 4)       int32   columns [month, day, weekday, hour]
    returns  : (B, L, d_model) out_dtype (bf16 by default; f32 available)
    """
    B, L, C = x.shape
    D = params["conv_w"].shape[0]

    # --- L tiling: balanced tiles, minimal padding (16-row sublane aligned) ---
    cap = max(16, _round_up(tile_len, 16))
    nt_l = max(1, -(-L // cap))                 # ceil(L / cap)
    TL = _round_up(-(-L // nt_l), 16)           # balanced tile size
    L_pad = nt_l * TL

    # --- batch grouping: big per-step blocks amortize per-step overhead ------
    NB = _largest_divisor_leq(B, max(1, max_rows_per_step // TL))
    if nt_l * (B // NB) < 2 and B >= 2:         # keep >=2 grid steps (v7x 2 TCs)
        NB = _largest_divisor_leq(B, B // 2)
    n_bg = B // NB

    # --- value stream: circular window (prev|cur|next) + fused conv taps -----
    x_prev = jnp.roll(x, 1, axis=1)
    x_next = jnp.roll(x, -1, axis=1)
    x_win = jnp.concatenate([x_prev, x, x_next], axis=-1)          # (B, L, 3C)
    x_win = x_win.astype(jnp.bfloat16)

    w = params["conv_w"]                                           # (D, C, 3)
    W = jnp.concatenate([w[:, :, 0].T, w[:, :, 1].T, w[:, :, 2].T],
                        axis=0).astype(jnp.bfloat16)               # (3C, D)

    # --- temporal indices packed 4 x 8-bit into one int32 per row ------------
    xm = x_mark.astype(jnp.int32)
    idx_packed = ((xm[:, :, 3] + _HOUR_OFF)
                  | ((xm[:, :, 2] + _WDAY_OFF) << 8)
                  | ((xm[:, :, 1] + _DAY_OFF) << 16)
                  | ((xm[:, :, 0] + _MON_OFF) << 24))[..., None]   # (B, L, 1)

    # --- stacked temporal table, exact hi/lo bf16 split -----------------------
    ttbl = jnp.concatenate(
        [params["hour_tbl"], params["weekday_tbl"],
         params["day_tbl"], params["month_tbl"]], axis=0)          # (76, D)
    ttbl = jnp.pad(ttbl, ((0, _TEMPORAL_ROWS_PAD - _TEMPORAL_ROWS), (0, 0)))
    t_hi = ttbl.astype(jnp.bfloat16)
    t_lo = (ttbl - t_hi.astype(jnp.float32)).astype(jnp.bfloat16)
    ttbl2 = jnp.stack([t_hi, t_lo], axis=0)                        # (2, 128, D)

    # --- positional slab: row l = pos_tbl[l + 1]; masked in-kernel ------------
    pos_slab = params["pos_tbl"][1:L + 1]                          # (L, D)
    pos_slab = jnp.pad(pos_slab, ((0, L_pad - L), (0, 0)))
    pos_slab = pos_slab.astype(jnp.bfloat16)                       # (Lp, D)

    # --- pad L to a multiple of TL (padded rows sliced off afterwards) --------
    if L_pad > L:
        x_win = jnp.pad(x_win, ((0, 0), (0, L_pad - L), (0, 0)))
        idx_packed = jnp.pad(idx_packed, ((0, 0), (0, L_pad - L), (0, 0)))

    # batch-group innermost -> weight / table / pos blocks reused across steps
    grid = (nt_l, n_bg)

    # rough VMEM budget (double-buffered blocks + resident tables)
    osz = jnp.dtype(out_dtype).itemsize
    blk = NB * TL * (D * osz + max(3 * C, 128) * 2 + 128 * 4) + TL * D * 2
    vmem_limit = int(min(64 << 20, max(32 << 20, 2 * blk + (2 << 20))))

    out = pl.pallas_call(
        data_embedding_kernel,
        out_shape=jax.ShapeDtypeStruct((B, L_pad, D), out_dtype),
        grid_spec=pltpu.PrefetchScalarGridSpec(
            num_scalar_prefetch=1,
            grid=grid,
            in_specs=[
                pl.BlockSpec((NB, TL, 3 * C), lambda li, bg, vlen: (bg, li, 0)),
                pl.BlockSpec((NB, TL, 1), lambda li, bg, vlen: (bg, li, 0)),
                pl.BlockSpec((3 * C, D), lambda li, bg, vlen: (0, 0)),
                pl.BlockSpec((2, _TEMPORAL_ROWS_PAD, D),
                             lambda li, bg, vlen: (0, 0, 0)),
                pl.BlockSpec((TL, D), lambda li, bg, vlen: (li, 0)),
            ],
            out_specs=pl.BlockSpec((NB, TL, D),
                                   lambda li, bg, vlen: (bg, li, 0)),
        ),
        compiler_params=pltpu.CompilerParams(
            dimension_semantics=("parallel", "parallel"),
            vmem_limit_bytes=vmem_limit,
        ),
    )(visit_len.astype(jnp.int32), x_win, idx_packed, W, ttbl2, pos_slab)

    # TODO(synk): Dropout(p=0.1) is identity (eval mode); no stochastic dropout.
    if L_pad > L:
        out = out[:, :L]
    return out


# ---------------------------------------------------------------------------
if __name__ == "__main__":
    B, L, C_IN, D_MODEL = 4, 10, 4, 32
    MAX_LEN = 500

    key = jax.random.PRNGKey(0)
    k_w, k_x, k_mark, k_len = jax.random.split(key, 4)

    params = {
        "conv_w": make_token_conv_weight(k_w, C_IN, D_MODEL),
        "hour_tbl": make_fixed_embedding_table(24, D_MODEL),
        "weekday_tbl": make_fixed_embedding_table(7, D_MODEL),
        "day_tbl": make_fixed_embedding_table(32, D_MODEL),
        "month_tbl": make_fixed_embedding_table(13, D_MODEL),
        "pos_tbl": make_positional_encoding_table(D_MODEL, MAX_LEN),
    }

    x = jax.random.normal(k_x, (B, L, C_IN), dtype=jnp.float32)
    # x_mark columns: [month in [0,13), day in [0,32), weekday in [0,7), hour in [0,24)]
    month = jax.random.randint(k_mark, (B, L, 1), 0, 13)
    day = jax.random.randint(jax.random.fold_in(k_mark, 1), (B, L, 1), 0, 32)
    weekday = jax.random.randint(jax.random.fold_in(k_mark, 2), (B, L, 1), 0, 7)
    hour = jax.random.randint(jax.random.fold_in(k_mark, 3), (B, L, 1), 0, 24)
    x_mark = jnp.concatenate([month, day, weekday, hour], axis=-1).astype(jnp.int32)
    visit_len = jax.random.randint(k_len, (B,), 1, L + 1).astype(jnp.int32)

    out = data_embedding_forward(x, visit_len, x_mark, params)
    out = jax.block_until_ready(out)
    assert out.shape == (B, L, D_MODEL), out.shape
    assert out.dtype == jnp.bfloat16, out.dtype
    print("KERNEL_OK")
</pallas_src>

<mosaic_0001>
module attributes {stable_mosaic.version = 11 : i64} {
  func.func @data_embedding_kernel(%arg0: i32, %arg1: i32, %arg2: memref<4xi32, #tpu.memory_space<smem>>, %arg3: memref<2x16x12xbf16, #tpu.memory_space<vmem>>, %arg4: memref<2x16x1xi32, #tpu.memory_space<vmem>>, %arg5: memref<12x32xbf16, #tpu.memory_space<vmem>>, %arg6: memref<2x128x32xbf16, #tpu.memory_space<vmem>>, %arg7: memref<16x32xbf16, #tpu.memory_space<vmem>>, %arg8: memref<2x16x32xbf16, #tpu.memory_space<vmem>>) attributes {dimension_semantics = [#tpu.dimension_semantics<parallel>, #tpu.dimension_semantics<parallel>], iteration_bounds = array<i64: 1, 2>, scalar_prefetch = 1 : i64, scratch_operands = 0 : i64, tpu.core_type = #tpu.core_type<tc>, window_params = [{transform_indices = @transform_0, window_bounds = array<i64: 2, 16, 12>}, {transform_indices = @transform_1, window_bounds = array<i64: 2, 16, 1>}, {pipeline_mode = #tpu.pipeline_mode<synchronous>, transform_indices = @transform_2, window_bounds = array<i64: 12, 32>}, {pipeline_mode = #tpu.pipeline_mode<synchronous>, transform_indices = @transform_3, window_bounds = array<i64: 2, 128, 32>}, {transform_indices = @transform_4, window_bounds = array<i64: 16, 32>}, {transform_indices = @transform_5, window_bounds = array<i64: 2, 16, 32>}]} {
    %c0 = arith.constant 0 : index
    %c0_0 = arith.constant 0 : index
    %0 = vector.load %arg5[%c0, %c0_0] : memref<12x32xbf16, #tpu.memory_space<vmem>>, vector<12x32xbf16>
    %c0_1 = arith.constant 0 : index
    %c0_2 = arith.constant 0 : index
    %c0_3 = arith.constant 0 : index
    %1 = vector.load %arg6[%c0_1, %c0_2, %c0_3] : memref<2x128x32xbf16, #tpu.memory_space<vmem>>, vector<1x128x32xbf16>
    %2 = vector.shape_cast %1 : vector<1x128x32xbf16> to vector<128x32xbf16>
    %c1 = arith.constant 1 : index
    %c0_4 = arith.constant 0 : index
    %c0_5 = arith.constant 0 : index
    %3 = vector.load %arg6[%c1, %c0_4, %c0_5] : memref<2x128x32xbf16, #tpu.memory_space<vmem>>, vector<1x128x32xbf16>
    %4 = vector.shape_cast %3 : vector<1x128x32xbf16> to vector<128x32xbf16>
    %c0_6 = arith.constant 0 : index
    %c0_7 = arith.constant 0 : index
    %5 = vector.load %arg7[%c0_6, %c0_7] : memref<16x32xbf16, #tpu.memory_space<vmem>>, vector<16x32xbf16>
    %6 = arith.extf %5 : vector<16x32xbf16> to vector<16x32xf32>
    %c16_i32 = arith.constant 16 : i32
    %7 = arith.muli %arg0, %c16_i32 : i32
    %8 = tpu.iota {dimensions = array<i32: 0>} : vector<16x1xi32>
    %9 = vector.broadcast %7 : i32 to vector<16x1xi32>
    %10 = arith.addi %9, %8 : vector<16x1xi32>
    %11 = tpu.iota {dimensions = array<i32: 1>} : vector<16x128xi32>
    %c0_8 = arith.constant 0 : index
    %c0_9 = arith.constant 0 : index
    %c0_10 = arith.constant 0 : index
    %12 = vector.load %arg3[%c0_8, %c0_9, %c0_10] : memref<2x16x12xbf16, #tpu.memory_space<vmem>>, vector<1x16x12xbf16>
    %13 = vector.shape_cast %12 : vector<1x16x12xbf16> to vector<16x12xbf16>
    %cst = arith.constant dense<0.000000e+00> : vector<16x32xf32>
    %14 = tpu.matmul %13, %0, %cst {dimension_numbers = #tpu.dot_dimension_numbers<[1], [0], [0], [1], [0, 0, 1, 1], [], []>} : vector<16x12xbf16>, vector<12x32xbf16>, vector<16x32xf32> -> vector<16x32xf32>
    %c0_11 = arith.constant 0 : index
    %c0_12 = arith.constant 0 : index
    %c0_13 = arith.constant 0 : index
    %15 = vector.load %arg4[%c0_11, %c0_12, %c0_13] : memref<2x16x1xi32, #tpu.memory_space<vmem>>, vector<1x16x1xi32>
    %16 = vector.shape_cast %15 : vector<1x16x1xi32> to vector<16x1xi32>
    %c127_i32 = arith.constant 127 : i32
    %17 = vector.broadcast %c127_i32 : i32 to vector<16x1xi32>
    %18 = arith.andi %16, %17 : vector<16x1xi32>
    %19 = vector.broadcast %18 : vector<16x1xi32> to vector<16x128xi32>
    %20 = arith.cmpi eq, %11, %19 : vector<16x128xi32>
    %c8_i32 = arith.constant 8 : i32
    %21 = vector.broadcast %c8_i32 : i32 to vector<16x1xi32>
    %22 = arith.shrsi %16, %21 : vector<16x1xi32>
    %c127_i32_14 = arith.constant 127 : i32
    %23 = vector.broadcast %c127_i32_14 : i32 to vector<16x1xi32>
    %24 = arith.andi %22, %23 : vector<16x1xi32>
    %25 = vector.broadcast %24 : vector<16x1xi32> to vector<16x128xi32>
    %26 = arith.cmpi eq, %11, %25 : vector<16x128xi32>
    %27 = arith.ori %20, %26 : vector<16x128xi1>
    %c16_i32_15 = arith.constant 16 : i32
    %28 = vector.broadcast %c16_i32_15 : i32 to vector<16x1xi32>
    %29 = arith.shrsi %16, %28 : vector<16x1xi32>
    %c127_i32_16 = arith.constant 127 : i32
    %30 = vector.broadcast %c127_i32_16 : i32 to vector<16x1xi32>
    %31 = arith.andi %29, %30 : vector<16x1xi32>
    %32 = vector.broadcast %31 : vector<16x1xi32> to vector<16x128xi32>
    %33 = arith.cmpi eq, %11, %32 : vector<16x128xi32>
    %34 = arith.ori %27, %33 : vector<16x128xi1>
    %c24_i32 = arith.constant 24 : i32
    %35 = vector.broadcast %c24_i32 : i32 to vector<16x1xi32>
    %36 = arith.shrsi %16, %35 : vector<16x1xi32>
    %c127_i32_17 = arith.constant 127 : i32
    %37 = vector.broadcast %c127_i32_17 : i32 to vector<16x1xi32>
    %38 = arith.andi %36, %37 : vector<16x1xi32>
    %39 = vector.broadcast %38 : vector<16x1xi32> to vector<16x128xi32>
    %40 = arith.cmpi eq, %11, %39 : vector<16x128xi32>
    %41 = arith.ori %34, %40 : vector<16x128xi1>
    %42 = arith.extui %41 : vector<16x128xi1> to vector<16x128xi32>
    %43 = arith.sitofp %42 : vector<16x128xi32> to vector<16x128xf32>
    %44 = arith.truncf %43 : vector<16x128xf32> to vector<16x128xbf16>
    %cst_18 = arith.constant dense<0.000000e+00> : vector<16x32xf32>
    %45 = tpu.matmul %44, %2, %cst_18 {dimension_numbers = #tpu.dot_dimension_numbers<[1], [0], [0], [1], [0, 0, 1, 1], [], []>} : vector<16x128xbf16>, vector<128x32xbf16>, vector<16x32xf32> -> vector<16x32xf32>
    %46 = arith.addf %14, %45 : vector<16x32xf32>
    %cst_19 = arith.constant dense<0.000000e+00> : vector<16x32xf32>
    %47 = tpu.matmul %44, %4, %cst_19 {dimension_numbers = #tpu.dot_dimension_numbers<[1], [0], [0], [1], [0, 0, 1, 1], [], []>} : vector<16x128xbf16>, vector<128x32xbf16>, vector<16x32xf32> -> vector<16x32xf32>
    %48 = arith.addf %46, %47 : vector<16x32xf32>
    %c2_i32 = arith.constant 2 : i32
    %49 = arith.muli %arg1, %c2_i32 : i32
    %c0_i32 = arith.constant 0 : i32
    %50 = arith.addi %49, %c0_i32 : i32
    %51 = arith.index_cast %50 : i32 to index
    %52 = memref.load %arg2[%51] : memref<4xi32, #tpu.memory_space<smem>>
    %53 = vector.broadcast %52 : i32 to vector<16x1xi32>
    %54 = arith.cmpi slt, %10, %53 : vector<16x1xi32>
    %cst_20 = arith.constant 0.000000e+00 : f32
    %55 = vector.shape_cast %54 : vector<16x1xi1> to vector<16x1xi1>
    %56 = vector.broadcast %55 : vector<16x1xi1> to vector<16x32xi1>
    %57 = vector.broadcast %cst_20 : f32 to vector<16x32xf32>
    %58 = arith.select %56, %6, %57 : vector<16x32xi1>, vector<16x32xf32>
    %59 = arith.addf %48, %58 : vector<16x32xf32>
    %60 = arith.truncf %59 : vector<16x32xf32> to vector<16x32xbf16>
    %c0_21 = arith.constant 0 : index
    %c0_22 = arith.constant 0 : index
    %c0_23 = arith.constant 0 : index
    %61 = vector.load %arg8[%c0_21, %c0_22, %c0_23] : memref<2x16x32xbf16, #tpu.memory_space<vmem>>, vector<1x16x32xbf16>
    %62 = vector.shape_cast %61 : vector<1x16x32xbf16> to vector<16x32xbf16>
    %63 = vector.shape_cast %60 : vector<16x32xbf16> to vector<1x16x32xbf16>
    tpu.vector_store %arg8[%c0_21, %c0_22, %c0_23], %63 {strides = array<i32>} : memref<2x16x32xbf16, #tpu.memory_space<vmem>>, vector<1x16x32xbf16>,
    %c1_24 = arith.constant 1 : index
    %c0_25 = arith.constant 0 : index
    %c0_26 = arith.constant 0 : index
    %64 = vector.load %arg3[%c1_24, %c0_25, %c0_26] : memref<2x16x12xbf16, #tpu.memory_space<vmem>>, vector<1x16x12xbf16>
    %65 = vector.shape_cast %64 : vector<1x16x12xbf16> to vector<16x12xbf16>
    %cst_27 = arith.constant dense<0.000000e+00> : vector<16x32xf32>
    %66 = tpu.matmul %65, %0, %cst_27 {dimension_numbers = #tpu.dot_dimension_numbers<[1], [0], [0], [1], [0, 0, 1, 1], [], []>} : vector<16x12xbf16>, vector<12x32xbf16>, vector<16x32xf32> -> vector<16x32xf32>
    %c1_28 = arith.constant 1 : index
    %c0_29 = arith.constant 0 : index
    %c0_30 = arith.constant 0 : index
    %67 = vector.load %arg4[%c1_28, %c0_29, %c0_30] : memref<2x16x1xi32, #tpu.memory_space<vmem>>, vector<1x16x1xi32>
    %68 = vector.shape_cast %67 : vector<1x16x1xi32> to vector<16x1xi32>
    %c127_i32_31 = arith.constant 127 : i32
    %69 = vector.broadcast %c127_i32_31 : i32 to vector<16x1xi32>
    %70 = arith.andi %68, %69 : vector<16x1xi32>
    %71 = vector.broadcast %70 : vector<16x1xi32> to vector<16x128xi32>
    %72 = arith.cmpi eq, %11, %71 : vector<16x128xi32>
    %c8_i32_32 = arith.constant 8 : i32
    %73 = vector.broadcast %c8_i32_32 : i32 to vector<16x1xi32>
    %74 = arith.shrsi %68, %73 : vector<16x1xi32>
    %c127_i32_33 = arith.constant 127 : i32
    %75 = vector.broadcast %c127_i32_33 : i32 to vector<16x1xi32>
    %76 = arith.andi %74, %75 : vector<16x1xi32>
    %77 = vector.broadcast %76 : vector<16x1xi32> to vector<16x128xi32>
    %78 = arith.cmpi eq, %11, %77 : vector<16x128xi32>
    %79 = arith.ori %72, %78 : vector<16x128xi1>
    %c16_i32_34 = arith.constant 16 : i32
    %80 = vector.broadcast %c16_i32_34 : i32 to vector<16x1xi32>
    %81 = arith.shrsi %68, %80 : vector<16x1xi32>
    %c127_i32_35 = arith.constant 127 : i32
    %82 = vector.broadcast %c127_i32_35 : i32 to vector<16x1xi32>
    %83 = arith.andi %81, %82 : vector<16x1xi32>
    %84 = vector.broadcast %83 : vector<16x1xi32> to vector<16x128xi32>
    %85 = arith.cmpi eq, %11, %84 : vector<16x128xi32>
    %86 = arith.ori %79, %85 : vector<16x128xi1>
    %c24_i32_36 = arith.constant 24 : i32
    %87 = vector.broadcast %c24_i32_36 : i32 to vector<16x1xi32>
    %88 = arith.shrsi %68, %87 : vector<16x1xi32>
    %c127_i32_37 = arith.constant 127 : i32
    %89 = vector.broadcast %c127_i32_37 : i32 to vector<16x1xi32>
    %90 = arith.andi %88, %89 : vector<16x1xi32>
    %91 = vector.broadcast %90 : vector<16x1xi32> to vector<16x128xi32>
    %92 = arith.cmpi eq, %11, %91 : vector<16x128xi32>
    %93 = arith.ori %86, %92 : vector<16x128xi1>
    %94 = arith.extui %93 : vector<16x128xi1> to vector<16x128xi32>
    %95 = arith.sitofp %94 : vector<16x128xi32> to vector<16x128xf32>
    %96 = arith.truncf %95 : vector<16x128xf32> to vector<16x128xbf16>
    %cst_38 = arith.constant dense<0.000000e+00> : vector<16x32xf32>
    %97 = tpu.matmul %96, %2, %cst_38 {dimension_numbers = #tpu.dot_dimension_numbers<[1], [0], [0], [1], [0, 0, 1, 1], [], []>} : vector<16x128xbf16>, vector<128x32xbf16>, vector<16x32xf32> -> vector<16x32xf32>
    %98 = arith.addf %66, %97 : vector<16x32xf32>
    %cst_39 = arith.constant dense<0.000000e+00> : vector<16x32xf32>
    %99 = tpu.matmul %96, %4, %cst_39 {dimension_numbers = #tpu.dot_dimension_numbers<[1], [0], [0], [1], [0, 0, 1, 1], [], []>} : vector<16x128xbf16>, vector<128x32xbf16>, vector<16x32xf32> -> vector<16x32xf32>
    %100 = arith.addf %98, %99 : vector<16x32xf32>
    %c2_i32_40 = arith.constant 2 : i32
    %101 = arith.muli %arg1, %c2_i32_40 : i32
    %c1_i32 = arith.constant 1 : i32
    %102 = arith.addi %101, %c1_i32 : i32
    %103 = arith.index_cast %102 : i32 to index
    %104 = memref.load %arg2[%103] : memref<4xi32, #tpu.memory_space<smem>>
    %105 = vector.broadcast %104 : i32 to vector<16x1xi32>
    %106 = arith.cmpi slt, %10, %105 : vector<16x1xi32>
    %cst_41 = arith.constant 0.000000e+00 : f32
    %107 = vector.shape_cast %106 : vector<16x1xi1> to vector<16x1xi1>
    %108 = vector.broadcast %107 : vector<16x1xi1> to vector<16x32xi1>
    %109 = vector.broadcast %cst_41 : f32 to vector<16x32xf32>
    %110 = arith.select %108, %6, %109 : vector<16x32xi1>, vector<16x32xf32>
    %111 = arith.addf %100, %110 : vector<16x32xf32>
    %112 = arith.truncf %111 : vector<16x32xf32> to vector<16x32xbf16>
    %c1_42 = arith.constant 1 : index
    %c0_43 = arith.constant 0 : index
    %c0_44 = arith.constant 0 : index
    %113 = vector.load %arg8[%c1_42, %c0_43, %c0_44] : memref<2x16x32xbf16, #tpu.memory_space<vmem>>, vector<1x16x32xbf16>
    %114 = vector.shape_cast %113 : vector<1x16x32xbf16> to vector<16x32xbf16>
    %115 = vector.shape_cast %112 : vector<16x32xbf16> to vector<1x16x32xbf16>
    tpu.vector_store %arg8[%c1_42, %c0_43, %c0_44], %115 {strides = array<i32>} : memref<2x16x32xbf16, #tpu.memory_space<vmem>>, vector<1x16x32xbf16>,
    return
  }
  func.func @transform_0(%arg0: i32, %arg1: i32, %arg2: memref<4xi32, #tpu.memory_space<smem>>) -> (i32, i32, i32) {
    %c0_i32 = arith.constant 0 : i32
    %c0_i32_0 = arith.constant 0 : i32
    return %arg1, %arg0, %c0_i32 : i32, i32, i32
  }
  func.func @transform_1(%arg0: i32, %arg1: i32, %arg2: memref<4xi32, #tpu.memory_space<smem>>) -> (i32, i32, i32) {
    %c0_i32 = arith.constant 0 : i32
    %c0_i32_0 = arith.constant 0 : i32
    return %arg1, %arg0, %c0_i32 : i32, i32, i32
  }
  func.func @transform_2(%arg0: i32, %arg1: i32, %arg2: memref<4xi32, #tpu.memory_space<smem>>) -> (i32, i32) {
    %c0_i32 = arith.constant 0 : i32
    %c0_i32_0 = arith.constant 0 : i32
    %c0_i32_1 = arith.constant 0 : i32
    return %c0_i32, %c0_i32_0 : i32, i32
  }
  func.func @transform_3(%arg0: i32, %arg1: i32, %arg2: memref<4xi32, #tpu.memory_space<smem>>) -> (i32, i32, i32) {
    %c0_i32 = arith.constant 0 : i32
    %c0_i32_0 = arith.constant 0 : i32
    %c0_i32_1 = arith.constant 0 : i32
    %c0_i32_2 = arith.constant 0 : i32
    return %c0_i32, %c0_i32_0, %c0_i32_1 : i32, i32, i32
  }
  func.func @transform_4(%arg0: i32, %arg1: i32, %arg2: memref<4xi32, #tpu.memory_space<smem>>) -> (i32, i32) {
    %c0_i32 = arith.constant 0 : i32
    %c0_i32_0 = arith.constant 0 : i32
    return %arg0, %c0_i32 : i32, i32
  }
  func.func @transform_5(%arg0: i32, %arg1: i32, %arg2: memref<4xi32, #tpu.memory_space<smem>>) -> (i32, i32, i32) {
    %c0_i32 = arith.constant 0 : i32
    %c0_i32_0 = arith.constant 0 : i32
    return %arg1, %arg0, %c0_i32 : i32, i32, i32
  }
}

</mosaic_0001>

<bundles_post_ra>
// kernel: tpu_custom_call.1
= control target key start
LH: loop header
LB: loop body
LE: loop exit
PB: predicated region body
PF: predicated region fallthrough
CT: control target
= control target key end

     0   :  { %s1838_s0 = inlined_call_operand.vmem [shape: s32[4], index: 0, kind: input, shape index: {}]   ;;  %s1839_s1 = inlined_call_operand.vmem [shape: bf16[4,16,12], index: 1, kind: input, shape index: {}]   ;;  %s1840_s2 = inlined_call_operand.vmem [shape: s32[4,16,1], index: 2, kind: input, shape index: {}]   ;;  %s1841_s3 = inlined_call_operand.vmem [shape: bf16[12,32], index: 3, kind: input, shape index: {}]   ;;  %s1842_s4 = inlined_call_operand.vmem [shape: bf16[2,128,32], index: 4, kind: input, shape index: {}]   ;;  %s1843_s5 = inlined_call_operand.vmem [shape: bf16[16,32], index: 5, kind: input, shape index: {}]   ;;  %s1844_s6 = inlined_call_operand.hbm [shape: bf16[4,16,32], index: 6, kind: output, shape index: {}]  }
   0x1   :  { %s11_s23 = sshll.u32 %s1838_s0, 4  ;;  %s12_s23 = int_to_ptr.vmem [resolvable:$true] %s11_s23 }
   0x2   :  { %s1358_s24 = scalar_lea.vmem %s12_s23, 16  ;;  %p1363_p1 = scmp.lt.s32.totalorder %s12_s23, %s12_s23 }
   0x3   :  { %p1359_p0 = scmp.ne.s32.totalorder %s12_s23, %s1358_s24  ;;  %p1364_p2 = scmp.lt.s32.totalorder %s1358_s24, %s1358_s24 }
   0x5   :  { %p1365_p3 = por %p1364_p2, %p1363_p1 }
   0x7   :  { %p1366_p4 = pnand %p1365_p3, %p1359_p0 }
   0x9   :  { %1369 = shalt.err (!%p1366_p4)  }
   0xa   :  { %s1452_s25 = smov [#allocation3]  }
   0xb   :  { %14 = dma.vmem_to_smem %s12_s23, 16, %s1452_s25, [#allocation2] }
   0xc   :  { %1422 = dma.done.wait [#allocation2], 16 }
   0xd   :  { %1423 = vsyncadd [#allocation2], 4294967280 }
   0xe   :  { %16 = sfence }
   0xf   :  { %17 = vsyncpa [#allocation5], 0 }
  0x10   :  { %19 = vsyncpa [#allocation5 + $0x1], 0  ;;  %s1498_s26 = smov 0   ;;  %s1500_s27 = smov 0  }
  0x11   :  { %s1502_s0 = smov 0   ;;  %s1504_s28 = smov 0  }
  0x12   :  { %s1506_s29 = smov 0   ;;  %s1508_s30 = smov 0  }
  0x13 LB: > { %s1052_s7 = sadd.s32 4294967295, %s1450_s30   ;;  %s1053_s8 = sadd.s32 4294967294, %s1450_s30   ;;  %s1450_s30 = sphi %s1508_s30, %s25_s30   ;;  %s1446_s29 = sphi %s1506_s29, %s1851_s29   ;;  %s1442_s28 = sphi %s1504_s28, %s1850_s28   ;;  %s1438_s0 = sphi %s1502_s0, %s1849_s0   ;;  %s1434_s27 = sphi %s1500_s27, %s1848_s27   ;;  %s1430_s26 = sphi %s1498_s26, %s1847_s26  }
  0x14   : > { %s34_s9 = sadd.s32 1, %s1446_s29  ;;  %s170_s10 = sadd.s32 1, %s1438_s0 }
  0x15   : > { %p35_p5 = scmp.ge.s32.totalorder %s34_s9, 2  ;;  %p180_p6 = scmp.ne.s32.totalorder %s1438_s0, %s1434_s27 }
  0x16   : > { %p181_p7 = scmp.eq.s32.totalorder %s1052_s7, 1  ;;  %p186_p8 = scmp.ne.s32.totalorder %s1434_s27, %s1430_s26 }
  0x17   : > { %s1853_s9 = smov (%p35_p5, %s34_s9), 0  ;;  %p187_p10 = scmp.eq.s32.totalorder %s1053_s8, 1 }
  0x18   : > { %p1538_p9 = por %p181_p7, %p180_p6  ;;  %s165_s12 = ssub.s32 %s1446_s29, %s1853_s9 }
  0x19   : > { %p1057_p11 = scmp.ge.s32.totalorder %s1450_s30, 1  ;;  %p168_p12 = scmp.eq.s32.totalorder %s165_s12, 0 }
  0x1a   : > { %p1545_p13 = por %p187_p10, %p186_p8  ;;  %p250_p0 = scmp.lt.s32.totalorder %s1450_s30, 3 }
  0x1b   : > { %s1551_s14 = scalar_select %p168_p12, %s1438_s0, %s170_s10  }
  0x1c   : > { %p251_p1 = pnand %p1057_p11, %p250_p0 }
  0x1d   : > { %s1554_s15 = sshll.u32 (!%p251_p1), %s1442_s28, 1  ;;  %v1559_v0 = vld [vmem:[%s1842_s4] sm:$0xff] (!%p251_p1)   ;;  %v1453_v1 = vmov (!%p251_p1), 0   ;;  %v1454_v3 = vmov (!%p251_p1), 0.0   ;;  %v1577_v4 = vld [vmem:[%s1842_s4 + $0x8] sm:$0xff] (!%p251_p1)   ;;  %v1590_v6 = vld [vmem:[%s1842_s4 + $0x10] sm:$0xff] (!%p251_p1)   ;;  %v371_v50 = vlaneseq (!%p251_p1) }
  0x1e   : > { %254 = sbr.rel (%p251_p1) target bundleno = 466 (0x1d2), region = 40  ;;  %1337 = vset.pattern.permute.xlu0 (!%p251_p1), %v1453_v1  ;;  %p300_p2 = scmp.lt.s32.totalorder (!%p251_p1), %s1554_s15, 3  ;;  %1338 = vset.pattern.permute.xlu1 (!%p251_p1), %v1453_v1  ;;  %v1565_v2 = vld [vmem:[%s1842_s4 + $0x40] sm:$0xff] (!%p251_p1)   ;;  %v1584_v5 = vld [vmem:[%s1842_s4 + $0x48] sm:$0xff] (!%p251_p1)   ;;  %v1604_v9 = vld [vmem:[%s1842_s4 + $0x50] sm:$0xff] (!%p251_p1)   ;;  %vm1455_vm0 = vmmov (!%p251_p1), 0  }
  0x1f   : > { %1183 = vmatprep.subr.bf16.mxu0 (!%p251_p1), %v1454_v3  ;;  %1209 = vmatprep.subr.bf16.mxu1 (!%p251_p1), %v1454_v3  ;;  %v1613_v17 = vld [vmem:[%s1842_s4 + $0x18] sm:$0xff] (!%p251_p1)   ;;  %v1627_v24 = vld [vmem:[%s1842_s4 + $0x20] sm:$0xff] (!%p251_p1)   ;;  %v1641_v28 = vld [vmem:[%s1842_s4 + $0x28] sm:$0xff] (!%p251_p1)   ;;  %v1695_v53 = vand.u32 (!%p251_p1), 127, %v371_v50  ;;  %vm543_vm11 = vcmask (!%p251_p1), 1045504   ;;  %s680_s19 = sld [smem:[#allocation3 + %s1554_s15]] (!%p251_p1) }
  0x20   : > { %1184 = vmatpush3.bf16.msra.mxu0 (!%p251_p1), %v1559_v0  ;;  %1210 = vmatpush3.bf16.msra.mxu1 (!%p251_p1), %v1565_v2  ;;  %v1618_v18 = vld [vmem:[%s1842_s4 + $0x58] sm:$0xff] (!%p251_p1)   ;;  %v1632_v25 = vld [vmem:[%s1842_s4 + $0x60] sm:$0xff] (!%p251_p1)   ;;  %v1649_v31 = vld [vmem:[%s1842_s4 + $0x68] sm:$0xff] (!%p251_p1)   ;;  %v1456_v62 = vmov (!%p251_p1), 1.0|1.0   ;;  %s899_s24 = sadd.s32 (!%p251_p1), 1, %s1554_s15 }
  0x21   : > { %1185 = vmatprep.subr.bf16.mxu0 (!%p251_p1), %v1454_v3  ;;  %1211 = vmatprep.subr.bf16.mxu1 (!%p251_p1), %v1454_v3  ;;  %v1663_v34 = vld [vmem:[%s1842_s4 + $0x30] sm:$0xff] (!%p251_p1)   ;;  %v1679_v40 = vld [vmem:[%s1842_s4 + $0x38] sm:$0xff] (!%p251_p1)   ;;  %v1355_v59 = vld [vmem:[%s1841_s3] sm:$0x3f] (!%p251_p1)   ;;  %s1457_s18 = smov (!%p251_p1), [#allocation4]  }
  0x22   : > { %v1668_v35 = vld [vmem:[%s1842_s4 + $0x70] sm:$0xff] (!%p251_p1)   ;;  %1199 = vmatprep.mubr.msk.bf16.mxu0 (!%p251_p1), %vm1455_vm0, %v1454_v3  ;;  %v1684_v41 = vld [vmem:[%s1842_s4 + $0x78] sm:$0xff] (!%p251_p1)   ;;  %1225 = vmatprep.mubr.msk.bf16.mxu1 (!%p251_p1), %vm1455_vm0, %v1454_v3  ;;  %v545_v61 = vsel (!%p251_p1), %vm543_vm11, %v1355_v59, 0 }
  0x24   : > { %1186 = vmatpush3.bf16.msra.mxu0 (!%p251_p1), %v1577_v4  ;;  %1212 = vmatpush3.bf16.msra.mxu1 (!%p251_p1), %v1584_v5 }
  0x25   : > { %s1570_s20 = scalar_select %p300_p2, %s1554_s15, 3  ;;  %1187 = vmatprep.subr.bf16.mxu0 %v1454_v3  ;;  %1213 = vmatprep.subr.bf16.mxu1 %v1454_v3 }
  0x26   : > { %s1138_s15 = sshll.u32 %s1442_s28, 8 }
  0x27   : > { %s1132_s25 = sshll.u32 %s1570_s20, 4  ;;  %s1131_s10 = sshll.u32 %s1570_s20, 3 }
  0x28   : > { %s1595_s16 = scalar_lea.vmem %s1840_s2, %s1132_s25  ;;  %1188 = vmatpush3.bf16.msra.mxu0 %v1590_v6  ;;  %1214 = vmatpush3.bf16.msra.mxu1 %v1604_v9  ;;  %s1654_s22 = scalar_lea.vmem %s1839_s1, %s1131_s10 }
  0x29   : > { %v381_v7 = vld [vmem:[%s1595_s16] sm:$0xff]  ;;  %v382_v8 = vld [vmem:[%s1595_s16 + $0x8] sm:$0xff]  ;;  %1189 = vmatprep.subr.bf16.mxu0 %v1454_v3  ;;  %1215 = vmatprep.subr.bf16.mxu1 %v1454_v3  ;;  %v1111_v26 = vld [vmem:[%s1595_s16 + $0x10] sm:$0xff]  ;;  %s900_s25 = sld [smem:[#allocation3 + %s899_s24]]  ;;  %s1782_s12 = scalar_lea.hbm %s1844_s6, %s1138_s15 }
  0x2a   : > { %v383_v10 = vand.u32 127, %v381_v7  ;;  %v393_v11 = vshra.s32 %v381_v7, 8  ;;  %v394_v12 = vshra.s32 %v382_v8, 8  ;;  %v384_v14 = vand.u32 127, %v382_v8  ;;  %v1112_v30 = vld [vmem:[%s1595_s16 + $0x18] sm:$0xff]  ;;  %v1356_v63 = vld [vmem:[%s1654_s22] sm:$0xff]  }
  0x2b   : > { %v407_v15 = vshra.s32 %v381_v7, 16  ;;  %v408_v16 = vshra.s32 %v382_v8, 16  ;;  %v421_v21 = vshra.s32 %v381_v7, 24  ;;  %v422_v23 = vshra.s32 %v382_v8, 24  ;;  %v1357_v1 = vld [vmem:[%s1654_s22 + $0x8] sm:$0xff]   ;;  %s295_s22 = sand.u32 1, %s1434_s27  }
  0x2c   : > { %386 = vperm.xlu0 %1337, %v383_v10   ;;  %v395_v13 = vand.u32 127, %v393_v11  ;;  %v396_v19 = vand.u32 127, %v394_v12  ;;  %1190 = vmatpush3.bf16.msra.mxu0 %v1613_v17  ;;  %v709_v32 = vand.u32 127, %v1111_v26  ;;  %v719_v33 = vshra.s32 %v1111_v26, 8  ;;  %s1058_s16 = sshll.u32 %s295_s22, 4  ;;  %s1792_s28 = scalar_lea.sflag [#allocation5], %s295_s22 }
  0x2d   : > { %v409_v20 = vand.u32 127, %v407_v15  ;;  %v410_v22 = vand.u32 127, %v408_v16  ;;  %1216 = vmatpush3.bf16.msra.mxu1 %v1618_v18  ;;  %1191 = vmatprep.subr.bf16.mxu0 %v1454_v3  ;;  %v423_v27 = vand.u32 127, %v421_v21  ;;  %v424_v29 = vand.u32 127, %v422_v23  ;;  %s1770_s23 = scalar_lea.vmem [#allocation4], %s1058_s16 }
  0x2e   : > { %398 = vperm.xlu1 %1338, %v395_v13   ;;  %1217 = vmatprep.subr.bf16.mxu1 %v1454_v3  ;;  %v710_v36 = vand.u32 127, %v1112_v30  ;;  %v720_v37 = vshra.s32 %v1112_v30, 8  ;;  %v721_v38 = vand.u32 127, %v719_v33  ;;  %v733_v39 = vshra.s32 %v1111_v26, 16  ;;  %s940_s7 = sshll.u32 %s1770_s23, 4  ;;  %s1784_s7 = int_to_ptr.vmem [resolvable:$true] %s940_s7 }
  0x2f   : > { %v734_v43 = vshra.s32 %v1112_v30, 16  ;;  %v747_v45 = vshra.s32 %v1111_v26, 24  ;;  %v748_v47 = vshra.s32 %v1112_v30, 24  ;;  %v372_v13 = vshrl.u32 %v371_v50, 7  ;;  %s1370_s17 = scalar_lea.vmem %s1784_s7, 256 }
  0x30   : > { %389 = vperm.xlu0 %1337, %v384_v14   ;;  %1192 = vmatpush3.bf16.msra.mxu0 %v1627_v24  ;;  %v722_v42 = vand.u32 127, %v720_v37  ;;  %v735_v44 = vand.u32 127, %v733_v39  ;;  %p1371_p3 = scmp.ne.s32.totalorder %s1784_s7, %s1370_s17 }
  0x31   : > { %1218 = vmatpush3.bf16.msra.mxu1 %v1632_v25  ;;  %1193 = vmatprep.subr.bf16.mxu0 %v1454_v3  ;;  %v736_v46 = vand.u32 127, %v734_v43  ;;  %v749_v48 = vand.u32 127, %v747_v45  ;;  %v750_v49 = vand.u32 127, %v748_v47 }
  0x32   : > { %401 = vperm.xlu1 %1338, %v396_v19   ;;  %1219 = vmatprep.subr.bf16.mxu1 %v1454_v3  ;;  %v681_v19 = vstv %s680_s19  ;;  %p1372_p4 = pnand %p1371_p3, %p1538_p9  ;;  %s1374_s19 = sshll.u32 %s1457_s18, 4  ;;  %s1375_s19 = int_to_ptr.vmem [resolvable:$false] %s1374_s19 }
  0x33   : > { %s1376_s20 = scalar_lea.vmem %s1375_s19, 512  ;;  %p1377_p6 = scmp.lt.s32.totalorder %s1784_s7, %s1375_s19 }
  0x34   : > { %412 = vperm.xlu0 %1337, %v409_v20   ;;  %1194 = vmatpush3.bf16.msra.mxu0 %v1641_v28  ;;  %v373_v20 = vadd.s32 8, %v372_v13  ;;  %p1373_p5 = pneg %p1372_p4  ;;  %p1378_p7 = scmp.lt.s32.totalorder %s1376_s20, %s1370_s17 }
  0x35   : > { %1220 = vmatpush3.bf16.msra.mxu1 %v1649_v31  ;;  %1195 = vmatprep.subr.bf16.mxu0 %v1454_v3 }
  0x36   : > { %415 = vperm.xlu1 %1338, %v410_v22   ;;  %1221 = vmatprep.subr.bf16.mxu1 %v1454_v3  ;;  %p1379_p8 = por %p1378_p7, %p1377_p6 }
  0x38   : > { %426 = vperm.xlu0 %1337, %v423_v27   ;;  %1196 = vmatpush3.bf16.msra.mxu0 %v1663_v34  ;;  %p1380_p10 = pnand %p1379_p8, %p1373_p5 }
  0x39   : > { %1222 = vmatpush3.bf16.msra.mxu1 %v1668_v35  ;;  %1197 = vmatprep.subr.bf16.mxu0 %v1454_v3 }
  0x3a   : > { %429 = vperm.xlu1 %1338, %v424_v29   ;;  %1223 = vmatprep.subr.bf16.mxu1 %v1454_v3 }
  0x3c   : > { %712 = vperm.xlu0 %1337, %v709_v32   ;;  %1198 = vmatpush3.bf16.msra.mxu0 %v1679_v40 }
  0x3d   : > { %1224 = vmatpush3.bf16.msra.mxu1 %v1684_v41  ;;  %1203 = vmatprep.subr.bf16.mxu0 %v1454_v3 }
  0x3e   : > { %715 = vperm.xlu1 %1338, %v710_v36   ;;  %1249 = vmatprep.subr.bf16.mxu1 %v1454_v3 }
  0x40   : > { %724 = vperm.xlu0 %1337, %v721_v38  }
  0x42   : > { %727 = vperm.xlu1 %1338, %v722_v42  }
  0x44   : > { %738 = vperm.xlu0 %1337, %v735_v44  }
  0x46   : > { %741 = vperm.xlu1 %1338, %v736_v46  }
  0x48   : > { %752 = vperm.xlu0 %1337, %v749_v48  }
  0x4a   : > { %755 = vperm.xlu1 %1338, %v750_v49  }
  0xab   : > { %v387_v51 = vpop.permute.xlu0 %386 }
  0xac   : > { %vm391_vm1 = vcmp.eq.s32.totalorder %v1695_v53, %v387_v51 }
  0xad   : > { %v399_v52 = vpop.permute.xlu1 %398 }
  0xae   : > { %vm403_vm2 = vcmp.eq.s32.totalorder %v1695_v53, %v399_v52 }
  0xaf   : > { %v390_v54 = vpop.permute.xlu0 %389  ;;  %vm405_vm5 = vmor %vm391_vm1, %vm403_vm2  ;;  %vm539_vm2 = vcmask 97280  }
  0xb0   : > { %vm392_vm6 = vcmp.eq.s32.totalorder %v1695_v53, %v390_v54 }
  0xb1   : > { %v402_v55 = vpop.permute.xlu1 %401 }
  0xb2   : > { %vm404_vm3 = vcmp.eq.s32.totalorder %v1695_v53, %v402_v55 }
  0xb3   : > { %v413_v56 = vpop.permute.xlu0 %412  ;;  %vm406_vm8 = vmor %vm392_vm6, %vm404_vm3 }
  0xb4   : > { %vm417_vm4 = vcmp.eq.s32.totalorder %v1695_v53, %v413_v56 }
  0xb5   : > { %v416_v57 = vpop.permute.xlu1 %415  ;;  %vm419_vm9 = vmor %vm405_vm5, %vm417_vm4 }
  0xb6   : > { %vm418_vm7 = vcmp.eq.s32.totalorder %v1695_v53, %v416_v57 }
  0xb7   : > { %v427_v58 = vpop.permute.xlu0 %426  ;;  %vm420_vm12 = vmor %vm406_vm8, %vm418_vm7 }
  0xb8   : > { %vm431_vm10 = vcmp.eq.s32.totalorder %v1695_v53, %v427_v58 }
  0xb9   : > { %v430_v60 = vpop.permute.xlu1 %429  ;;  %vm433_vm13 = vmor %vm419_vm9, %vm431_vm10 }
  0xba   : > { %vm432_vm14 = vcmp.eq.s32.totalorder %v1695_v53, %v430_v60 }
  0xbb   : > { %vm434_vm15 = vmor %vm420_vm12, %vm432_vm14  ;;  %v713_v8 = vpop.permute.xlu0 %712 }
  0xbc   : > { %vm1091_vm1 = vmpackc.low %vm434_vm15, %vm433_vm13  ;;  %vm717_vm4 = vcmp.eq.s32.totalorder %v1695_v53, %v713_v8 }
  0xbd   : > { %1200 = vmatmul.mubr.msk.bf16.vlgmr.msra.gmra.mrb[0].mxu0 %vm1091_vm1, %v1456_v62  ;;  %1226 = vmatmul.mubr.msk.bf16.vlgmr.msra.gmra.mrb[0].mxu1 %vm1091_vm1, %v1456_v62  ;;  %v716_v7 = vpop.permute.xlu1 %715 }
  0xbe   : > { %1204 = vmatpush3.bf16.msra.mxu0 %v545_v61  ;;  %1250 = vmatpush3.bf16.msra.mxu1 %v545_v61  ;;  %vm718_vm6 = vcmp.eq.s32.totalorder %v1695_v53, %v716_v7 }
  0xbf   : > { %1205 = vmatprep.mubr.msk.bf16.mxu0 %vm1455_vm0, %v1454_v3  ;;  %1229 = vmatprep.subr.bf16.mxu0 %v1454_v3 }
  0xc0   : > { %1251 = vmatprep.mubr.msk.bf16.mxu1 %vm1455_vm0, %v1454_v3  ;;  %1255 = vmatprep.subr.bf16.mxu1 %v1454_v3 }
  0xc5   : > { %1206 = vmatmul.mubr.msk.bf16.vlgmr.msra.gmra.mrb[4].mxu0 %vm539_vm2, %v1356_v63  ;;  %1252 = vmatmul.mubr.msk.bf16.vlgmr.msra.gmra.mrb[4].mxu1 %vm539_vm2, %v1357_v1  ;;  %vm682_vm2 = vcmp.lt.s32.totalorder %v372_v13, %v681_v19 }
  0xc6   : > { %1230 = vmatpush3.bf16.msra.mxu0 %v1559_v0  ;;  %1256 = vmatpush3.bf16.msra.mxu1 %v1565_v2  ;;  %v728_v0 = vpop.permute.xlu1 %727  ;;  %v725_v2 = vpop.permute.xlu0 %724 }
  0xc7   : > { %1231 = vmatprep.subr.bf16.mxu0 %v1454_v3  ;;  %1257 = vmatprep.subr.bf16.mxu1 %v1454_v3  ;;  %vm730_vm3 = vcmp.eq.s32.totalorder %v1695_v53, %v728_v0 }
  0xc8   : > { %1245 = vmatprep.mubr.msk.bf16.mxu0 %vm1455_vm0, %v1454_v3  ;;  %1271 = vmatprep.mubr.msk.bf16.mxu1 %vm1455_vm0, %v1454_v3  ;;  %vm729_vm0 = vcmp.eq.s32.totalorder %v1695_v53, %v725_v2  ;;  %vm732_vm9 = vmor %vm718_vm6, %vm730_vm3  ;;  %vm700_vm3 = vcmask 257024  }
  0xc9   : > { %vm731_vm7 = vmor %vm717_vm4, %vm729_vm0  ;;  %vm683_vm0 = vcmp.lt.s32.totalorder %v373_v20, %v681_v19 }
  0xca   : > { %1232 = vmatpush3.bf16.msra.mxu0 %v1577_v4  ;;  %1258 = vmatpush3.bf16.msra.mxu1 %v1584_v5  ;;  %v742_v4 = vpop.permute.xlu1 %741  ;;  %v739_v5 = vpop.permute.xlu0 %738 }
  0xcb   : > { %1233 = vmatprep.subr.bf16.mxu0 %v1454_v3  ;;  %1259 = vmatprep.subr.bf16.mxu1 %v1454_v3  ;;  %vm744_vm5 = vcmp.eq.s32.totalorder %v1695_v53, %v742_v4  ;;  %vm743_vm10 = vcmp.eq.s32.totalorder %v1695_v53, %v739_v5 }
  0xcc   : > { %vm746_vm11 = vmor %vm732_vm9, %vm744_vm5 }
  0xcd   : > { %vm745_vm14 = vmor %vm731_vm7, %vm743_vm10 }
  0xce   : > { %1234 = vmatpush3.bf16.msra.mxu0 %v1590_v6  ;;  %1260 = vmatpush3.bf16.msra.mxu1 %v1604_v9  ;;  %v756_v6 = vpop.permute.xlu1 %755  ;;  %v753_v9 = vpop.permute.xlu0 %752 }
  0xcf   : > { %1235 = vmatprep.subr.bf16.mxu0 %v1454_v3  ;;  %1261 = vmatprep.subr.bf16.mxu1 %v1454_v3  ;;  %vm758_vm8 = vcmp.eq.s32.totalorder %v1695_v53, %v756_v6  ;;  %vm757_vm12 = vcmp.eq.s32.totalorder %v1695_v53, %v753_v9 }
  0xd0   : > { %vm760_vm13 = vmor %vm746_vm11, %vm758_vm8 }
  0xd1   : > { %vm759_vm15 = vmor %vm745_vm14, %vm757_vm12 }
  0xd2   : > { %1236 = vmatpush3.bf16.msra.mxu0 %v1613_v17  ;;  %1262 = vmatpush3.bf16.msra.mxu1 %v1618_v18  ;;  %vm1115_vm1 = vmpackc.low %vm760_vm13, %vm759_vm15  ;;  %v1140_v18 = vld [vmem:[%s1843_s5] sm:$0xff]  }
  0xd3   : > { %1237 = vmatprep.subr.bf16.mxu0 %v1454_v3  ;;  %1263 = vmatprep.subr.bf16.mxu1 %v1454_v3  ;;  %v1141_v21 = vunpack.c.l.bf16 %v1140_v18 }
  0xd6   : > { %1238 = vmatpush3.bf16.msra.mxu0 %v1627_v24  ;;  %1264 = vmatpush3.bf16.msra.mxu1 %v1632_v25  ;;  %v1142_v24 = vunpack.c.h.bf16 %v1140_v18 }
  0xd7   : > { %1239 = vmatprep.subr.bf16.mxu0 %v1454_v3  ;;  %1265 = vmatprep.subr.bf16.mxu1 %v1454_v3 }
  0xda   : > { %1240 = vmatpush3.bf16.msra.mxu0 %v1641_v28  ;;  %1266 = vmatpush3.bf16.msra.mxu1 %v1649_v31  ;;  %v688_v28 = vsel %vm682_vm2, %v1141_v21, 0.0 }
  0xdb   : > { %1241 = vmatprep.subr.bf16.mxu0 %v1454_v3  ;;  %1267 = vmatprep.subr.bf16.mxu1 %v1454_v3 }
  0xde   : > { %1242 = vmatpush3.bf16.msra.mxu0 %v1663_v34  ;;  %1268 = vmatpush3.bf16.msra.mxu1 %v1668_v35  ;;  %v689_v35 = vsel %vm683_vm0, %v1142_v24, 0.0 }
  0xdf   : > { %1243 = vmatprep.subr.bf16.mxu0 %v1454_v3  ;;  %1269 = vmatprep.subr.bf16.mxu1 %v1454_v3 }
  0xe2   : > { %1244 = vmatpush3.bf16.msra.mxu0 %v1679_v40  ;;  %1270 = vmatpush3.bf16.msra.mxu1 %v1684_v41  ;;  %v901_v41 = vstv %s900_s25 }
  0xe3   : > { %vm902_vm4 = vcmp.lt.s32.totalorder %v372_v13, %v901_v41  ;;  %vm903_vm5 = vcmp.lt.s32.totalorder %v373_v20, %v901_v41 }
  0xe4   : > { %v908_v47 = vsel %vm902_vm4, %v1141_v21, 0.0  ;;  %v909_v54 = vsel %vm903_vm5, %v1142_v24, 0.0 }
  0xe5   : > { %1246 = vmatmul.mubr.msk.bf16.vlgmr.msra.gmra.mrb[8].mxu0 %vm1115_vm1, %v1456_v62  ;;  %1272 = vmatmul.mubr.msk.bf16.vlgmr.msra.gmra.mrb[8].mxu1 %vm1115_vm1, %v1456_v62 }
 0x190   : > { %v522_v10 = vpop.f32.mrb[0].mxu0  ;;  %v670_v11 = vpop.f32.mrb[0].mxu1 }
 0x191   : > { %v1201_v3 = vpop.f32.mrb[1].mxu0  ;;  %v1227_v12 = vpop.f32.mrb[1].mxu1 }
 0x192   : > { %v525_v14 = vpop.f32.mrb[2].mxu0  ;;  %v673_v15 = vpop.f32.mrb[2].mxu1 }
 0x193   : > { %v1202_v16 = vpop.f32.mrb[3].mxu0  ;;  %v1228_v17 = vpop.f32.mrb[3].mxu1 }
 0x198   : > { %v581_v22 = vpop.f32.mrb[4].mxu0  ;;  %v849_v23 = vpop.f32.mrb[4].mxu1 }
 0x199   : > { %v582_v25 = vadd.f32 %v581_v22, %v522_v10  ;;  %v1207_v26 = vpop.f32.mrb[5].mxu0  ;;  %v1253_v27 = vpop.f32.mrb[5].mxu1 }
 0x19a   : > { %v584_v29 = vpop.f32.mrb[6].mxu0  ;;  %v852_v30 = vpop.f32.mrb[6].mxu1 }
 0x19b   : > { %v677_v31 = vadd.f32 %v670_v11, %v582_v25  ;;  %v585_v32 = vadd.f32 %v584_v29, %v525_v14  ;;  %v1208_v33 = vpop.f32.mrb[7].mxu0  ;;  %v1254_v34 = vpop.f32.mrb[7].mxu1 }
 0x19d   : > { %v690_v36 = vadd.f32 %v688_v28, %v677_v31  ;;  %v678_v37 = vadd.f32 %v673_v15, %v585_v32 }
 0x19f   : > { %v1133_v38 = vpack.c.bf16 %v690_v36, %v690_v36  ;;  %v691_v39 = vadd.f32 %v689_v35, %v678_v37 }
 0x1a1   : > { %701 = vst.msk [vmem:[%s1770_s23] sm:$0xf] %vm700_vm3, %v1133_v38  ;;  %v1134_v40 = vpack.c.bf16 %v691_v39, %v691_v39 }
 0x1a3   : > { %702 = vst.msk [vmem:[%s1770_s23 + $0x4] sm:$0xf] %vm700_vm3, %v1134_v40 }
 0x1b8   : > { %v800_v42 = vpop.f32.mrb[8].mxu0  ;;  %v890_v43 = vpop.f32.mrb[8].mxu1 }
 0x1b9   : > { %v850_v44 = vadd.f32 %v849_v23, %v800_v42  ;;  %v1247_v45 = vpop.f32.mrb[9].mxu0  ;;  %v1273_v46 = vpop.f32.mrb[9].mxu1 }
 0x1ba   : > { %v803_v48 = vpop.f32.mrb[10].mxu0  ;;  %v893_v49 = vpop.f32.mrb[10].mxu1 }
 0x1bb   : > { %v897_v50 = vadd.f32 %v890_v43, %v850_v44  ;;  %v853_v51 = vadd.f32 %v852_v30, %v803_v48  ;;  %v1248_v52 = vpop.f32.mrb[11].mxu0  ;;  %v1274_v53 = vpop.f32.mrb[11].mxu1 }
 0x1bd   : > { %v910_v55 = vadd.f32 %v908_v47, %v897_v50  ;;  %v898_v56 = vadd.f32 %v893_v49, %v853_v51 }
 0x1bf   : > { %v1135_v57 = vpack.c.bf16 %v910_v55, %v910_v55  ;;  %v911_v58 = vadd.f32 %v909_v54, %v898_v56 }
 0x1c1   : > { %1123 = vst.msk [vmem:[%s1770_s23 + $0x8] sm:$0xf] %vm700_vm3, %v1135_v57  ;;  %v1136_v59 = vpack.c.bf16 %v911_v58, %v911_v58 }
 0x1c3   : > { %1124 = vst.msk [vmem:[%s1770_s23 + $0xc] sm:$0xf] %vm700_vm3, %v1136_v59 }
 0x1c4   : > { %1383 = shalt.err (!%p1380_p10)
}
 0x1c5   : > { %s1384_s21 = scalar_lea.hbm %s1782_s12, 256  ;;  %s1388_s23 = scalar_lea.hbm %s1844_s6, 512 }
 0x1c6   : > { %p1385_p11 = scmp.ne.s32.totalorder %s1782_s12, %s1384_s21  ;;  %p1389_p1 = scmp.lt.u32.totalorder %s1782_s12, %s1844_s6 }
 0x1c7   : > { %p1390_p2 = scmp.lt.u32.totalorder %s1388_s23, %s1384_s21  ;;  %p1392_p4 = scmp.lt.u32.totalorder %s1384_s21, %s1782_s12 }
 0x1c8   : > { %p1386_p12 = pnand %p1385_p11, %p1538_p9 }
 0x1c9   : > { %p1391_p3 = por %p1390_p2, %p1389_p1 }
 0x1ca   : > { %p1387_p0 = pneg %p1386_p12 }
 0x1cb   : > { %p1393_p5 = por %p1392_p4, %p1391_p3 }
 0x1cd   : > { %p1394_p6 = pnand %p1393_p5, %p1387_p0 }
 0x1cf   : > { %1397 = shalt.err (!%p1394_p6)
}
 0x1d0   : > { %s1458_s15 = smov 64   ;;  %s1459_s8 = smov 4  }
 0x1d1   : > { %1275 = dma.vmem_to_hbm [thread:$0]  (%p1538_p9), %s1784_s7, 256, %s1782_s12, %s1792_s28, %s1458_s15, %s1458_s15, %s1459_s8  }
 0x1d2 PF: > { %p1281_p7 = scmp.ge.s32.totalorder %s1450_s30, 2  ;;  %s955_s10 = sand.u32 1, %s1430_s26  }
 0x1d3   : > { %s956_s17 = scalar_lea.sflag [#allocation5], %s955_s10 }
 0x1d4   : > { %p1278_p8 = pnand %p1281_p7, %p1545_p13 }
 0x1d6   : > { %1425 = dma.done.wait (!%p1278_p8), %s956_s17, 256  }
 0x1d7   : > { %1427 = vsyncadd (!%p1278_p8), %s956_s17, 4294967040  ;;  %s25_s30 = sadd.s32 1, %s1450_s30   ;;  %s1847_s26 = smov %s1434_s27 }
 0x1d8   : > { %p22_p10 = scmp.ge.s32.totalorder %s25_s30, 4   ;;  %s1848_s27 = smov %s1438_s0 }
 0x1d9   : > { %s1849_s0 = smov %s1551_s14  ;;  %s1850_s28 = smov %s1446_s29 }
 0x1da   : > { %s1851_s29 = smov %s1853_s9  ;;  %24 = sbr.rel (!%p22_p10) target bundleno = 19 (0x13), region = 85 }
 0x1e1   :  { %961 = vsyncpa [#allocation5], 1 }
 0x1e2   :  { %963 = vsyncpa [#allocation5 + $0x1], 1 }

</bundles_post_ra>
